<compile_context>
chip_gen: v7x
topology: tpu7x:2x2x1
jax: 0.10.0
libtpu: 0.0.40
codegen_flags: <defaults>
</compile_context>

<pallas_src>
import jax
import jax.numpy as jnp
from jax.experimental import pallas as pl
from jax.experimental.pallas import tpu as pltpu


def _round_up(x, m):
    return (x + m - 1) // m * m


def _vmem_capacity_bytes():
    try:
        return int(pltpu.get_tpu_info().vmem_capacity_bytes)
    except Exception:
        return 64 << 20  # conservative (v7x per-TensorCore)


def _num_tensorcores():
    # v7x has 2 TensorCores per chip; v5e/v6e have 1.
    try:
        kind = str(getattr(jax.devices()[0], "device_kind", "")).lower()
        if "v7" in kind or "7x" in kind:
            return 2
    except Exception:
        pass
    return 1


def _vmem_budget_bytes(tm, tk, F_pad, N_pad, act_bytes, w_bytes):
    """Rough VMEM footprint of the pipelined kernel for a given tiling."""
    return (2 * tm * tk * act_bytes        # x tile (double-buffered)
            + 2 * tk * F_pad * w_bytes     # backbone W tile (double-buffered)
            + 1 * F_pad * 4                # backbone bias (single-buffered)
            + 1 * F_pad * N_pad * w_bytes  # concat head W (single-buffered, resident)
            + 1 * N_pad * 4                # concat head bias (single-buffered)
            + 2 * tm * N_pad * 4           # output tile (double-buffered)
            + tm * F_pad * 4)              # f32 feature accumulator scratch


# ----------------------------------------------------------------------------
# Fused Pallas kernel:
#   acc   = b1 (init at k==0);  acc += x_tile @ W1_tile   (bf16 MXU, f32 acc)
#   feats = relu(acc)  (in place);  out = feats @ W2_concat + b2  (lane-dense)
# ----------------------------------------------------------------------------
def _fused_forward_kernel(x_ref, w1_ref, b1_ref, w2_ref, b2_ref, o_ref, acc_ref):
    # grid = (B_pad // tm, K_pad // tk); axis 1 is the reduction.
    k = pl.program_id(1)

    @pl.when(k == 0)
    def _():
        # Fold the backbone bias into the accumulator init.
        acc_ref[...] = jnp.broadcast_to(b1_ref[...], acc_ref.shape)

    acc_ref[...] += jnp.dot(
        x_ref[...], w1_ref[...], preferred_element_type=jnp.float32
    )

    @pl.when(k == pl.num_programs(1) - 1)
    def _():
        acc_ref[...] = jnp.maximum(acc_ref[...], 0.0)  # ReLU in place
        out = jnp.dot(
            acc_ref[...].astype(w2_ref.dtype),
            w2_ref[...],
            preferred_element_type=jnp.float32,
        ) + b2_ref[...]
        o_ref[...] = out.astype(o_ref.dtype)


def _fused_forward(x_flat, kp):
    """x_flat: [B, K] f32 -> padded logits [B, N_pad] f32 (all heads concatenated)."""
    B, K = x_flat.shape
    assert K == kp["K"], (K, kp["K"])
    tk, K_pad, F_pad, N_pad = kp["tk"], kp["K_pad"], kp["F_pad"], kp["N_pad"]
    act_dtype, weight_dtype = kp["act_dtype"], kp["weight_dtype"]
    act_bytes = jnp.dtype(act_dtype).itemsize
    w_bytes = jnp.dtype(weight_dtype).itemsize

    cap = _vmem_capacity_bytes()
    n_cores = _num_tensorcores()

    # Cast activations once (bf16 when weights are bf16); pad K lanes only if needed.
    x = x_flat.astype(act_dtype)
    if K_pad != K:
        x = jnp.pad(x, ((0, 0), (0, K_pad - K)))

    # --- batch tiling: minimize padding waste, keep >=2 tiles on 2-TC chips ---
    B_pad0 = _round_up(max(B, 8), 8)
    tm_max = min(128 if cap <= (64 << 20) else 256, B_pad0)
    cands = [t for t in range(8, tm_max + 1, 8)
             if _vmem_budget_bytes(t, tk, F_pad, N_pad, act_bytes, w_bytes)
             <= int(cap * 0.85)]
    if not cands:
        cands = [8]
    if n_cores >= 2 and B_pad0 >= 16:
        two_tile = [t for t in cands if t <= B_pad0 - 8]  # guarantees >= 2 batch tiles
        if two_tile:
            cands = two_tile

    def _cost(t):
        tiles = -(-B_pad0 // t)
        return (tiles * t - B_pad0, tiles)  # (padding waste, W1 re-streams)

    tm = min(cands, key=_cost)
    B_pad = _round_up(B_pad0, tm)
    if B_pad != B:
        x = jnp.pad(x, ((0, B_pad - B), (0, 0)))  # pad batch rows only

    grid = (B_pad // tm, K_pad // tk)

    budget = _vmem_budget_bytes(tm, tk, F_pad, N_pad, act_bytes, w_bytes)
    vmem_limit = int(min(cap - (2 << 20), max(budget + (16 << 20), 48 << 20)))

    flops = 2 * B_pad * K_pad * F_pad + 2 * B_pad * F_pad * N_pad
    bytes_accessed = (
        B_pad * K_pad * act_bytes
        + (B_pad // tm) * K_pad * F_pad * w_bytes     # W1 re-streamed per batch tile
        + F_pad * N_pad * w_bytes
        + (F_pad + N_pad) * 4
        + B_pad * N_pad * 4
    )
    cost_est = pl.CostEstimate(
        flops=int(flops), transcendentals=0, bytes_accessed=int(bytes_accessed)
    )

    def _call(use_buffered):
        const_kwargs = {"pipeline_mode": pl.Buffered(1)} if use_buffered else {}
        in_specs = [
            pl.BlockSpec((tm, tk), lambda i, k: (i, k)),                       # x tile
            pl.BlockSpec((tk, F_pad), lambda i, k: (k, 0)),                    # W1 tile
            pl.BlockSpec((1, F_pad), lambda i, k: (0, 0), **const_kwargs),     # b1
            pl.BlockSpec((F_pad, N_pad), lambda i, k: (0, 0), **const_kwargs), # W2 concat
            pl.BlockSpec((1, N_pad), lambda i, k: (0, 0), **const_kwargs),     # b2 concat
        ]
        return pl.pallas_call(
            _fused_forward_kernel,
            out_shape=jax.ShapeDtypeStruct((B_pad, N_pad), jnp.float32),
            grid=grid,
            in_specs=in_specs,
            out_specs=pl.BlockSpec((tm, N_pad), lambda i, k: (i, 0)),
            scratch_shapes=[pltpu.VMEM((tm, F_pad), jnp.float32)],
            compiler_params=pltpu.CompilerParams(
                dimension_semantics=("parallel", "arbitrary"),
                vmem_limit_bytes=vmem_limit,
            ),
            cost_estimate=cost_est,
        )(x, kp["w1"], kp["b1"], kp["w2"], kp["b2"])

    try:
        out = _call(use_buffered=True)
    except Exception:
        # Older Pallas versions may reject pipeline_mode / Buffered(1).
        out = _call(use_buffered=False)
    return out[:B]


# ----------------------------------------------------------------------------
# Parameter init (PyTorch Linear conventions) + one-time kernel-layout prep
# ----------------------------------------------------------------------------
def init_params(key, in_features, n_feat, out_dims):
    """PyTorch-shaped params: Linear weight is [out, in], bias [out]."""
    params = {}
    k_bb_w, k_bb_b, k_heads = jax.random.split(key, 3)
    params["backbone"] = {
        "w": 0.02 * jax.random.normal(k_bb_w, (n_feat, in_features), jnp.float32),
        "b": 0.02 * jax.random.normal(k_bb_b, (n_feat,), jnp.float32),
    }
    params["last"] = {}
    head_keys = jax.random.split(k_heads, len(out_dims))
    for hk, (task, dim) in zip(head_keys, out_dims.items()):
        kw, kb = jax.random.split(hk)
        params["last"][task] = {
            "w": 0.02 * jax.random.normal(kw, (dim, n_feat), jnp.float32),
            "b": 0.02 * jax.random.normal(kb, (dim,), jnp.float32),
        }
    return params


def prepare_kernel_params(torch_params, out_dims, *, weight_dtype=jnp.bfloat16, tk=None):
    """One-time transform: transpose to [in, out], concat heads, cast to bf16,
    pad to lane/tile multiples.  The per-forward hot path never transposes,
    re-casts, or copies weights."""
    weight_dtype = jnp.dtype(weight_dtype)
    act_dtype = jnp.bfloat16 if weight_dtype == jnp.dtype(jnp.bfloat16) else jnp.float32
    w_bytes = weight_dtype.itemsize

    w1_t = torch_params["backbone"]["w"].T.astype(weight_dtype)  # [K, F]
    b1 = torch_params["backbone"]["b"].astype(jnp.float32)
    K, F = w1_t.shape

    K_pad = _round_up(K, 128)
    F_pad = _round_up(F, 128)  # lane-dense intermediate

    # K tile: lane-aligned, divides K_pad exactly, generation-aware target
    # (tk=512 fits v5e/v6e comfortably; keep 512 only with bf16 on v7x's 64 MiB).
    if tk is None:
        cap = _vmem_capacity_bytes()
        target = 512 if (w_bytes <= 2 or cap > (64 << 20)) else 256
    else:
        target = tk
    target = min(_round_up(target, 128), K_pad)
    tk = 128
    for cand in range(target, 127, -128):
        if K_pad % cand == 0:
            tk = cand
            break

    head_slices = {}
    ws, bs = [], []
    off = 0
    for task, dim in out_dims.items():
        p = torch_params["last"][task]
        ws.append(p["w"].T.astype(weight_dtype))  # [F, dim]
        bs.append(p["b"].astype(jnp.float32))
        head_slices[task] = (off, dim)
        off += dim
    n_total = off
    w2 = jnp.concatenate(ws, axis=1)  # [F, sum(dims)]
    b2 = jnp.concatenate(bs, axis=0)
    N_pad = _round_up(n_total, 128)   # lane-dense output (no masked vst)

    w1_p = jnp.zeros((K_pad, F_pad), weight_dtype).at[:K, :F].set(w1_t)
    b1_p = jnp.zeros((1, F_pad), jnp.float32).at[0, :F].set(b1)
    w2_p = jnp.zeros((F_pad, N_pad), weight_dtype).at[:F, :n_total].set(w2)
    b2_p = jnp.zeros((1, N_pad), jnp.float32).at[0, :n_total].set(b2)

    return {
        "w1": w1_p, "b1": b1_p, "w2": w2_p, "b2": b2_p,
        "K": K, "K_pad": K_pad, "tk": tk, "F_pad": F_pad, "N_pad": N_pad,
        "head_slices": head_slices,
        "weight_dtype": weight_dtype, "act_dtype": jnp.dtype(act_dtype),
    }


# ----------------------------------------------------------------------------
# NormalNN.forward / model.logits: returns {task: [B, out_dim]}
# ----------------------------------------------------------------------------
def normal_nn_forward(kernel_params, x_nchw):
    x = x_nchw.astype(jnp.float32)  # predict() calls inputs.float()
    B = x.shape[0]
    feat_in = x.reshape(B, -1)      # flatten NCHW -> [B, C*H*W]
    logits_all = _fused_forward(feat_in, kernel_params)
    outputs = {}
    for task, (off, dim) in kernel_params["head_slices"].items():
        outputs[task] = logits_all[:, off:off + dim]
    return outputs


if __name__ == "__main__":
    # Small shapes consistent with an image-classification forward pass.
    B, C, H, W = 2, 4, 16, 16
    n_feat = 32
    out_dims = {"FER": 7, "AU": 12, "AV": 2}  # multi-head: one Linear per task

    key = jax.random.PRNGKey(0)
    k_x, k_p = jax.random.split(key)
    x = jax.random.normal(k_x, (B, C, H, W), jnp.float32)

    torch_params = init_params(k_p, C * H * W, n_feat, out_dims)
    kparams = prepare_kernel_params(torch_params, out_dims)  # bf16 weights, f32 accumulate

    out = normal_nn_forward(kparams, x)
    out = jax.tree_util.tree_map(jax.block_until_ready, out)

    # Reference mimicking the kernel's numerics (bf16 operands, f32 accumulation).
    wd, ad = kparams["weight_dtype"], kparams["act_dtype"]
    x_flat = x.reshape(B, -1)
    feats_ref = jnp.maximum(
        jnp.dot(x_flat.astype(ad), torch_params["backbone"]["w"].T.astype(wd),
                preferred_element_type=jnp.float32)
        + torch_params["backbone"]["b"],
        0.0,
    )
    for task, p in torch_params["last"].items():
        ref = jnp.dot(feats_ref.astype(wd), p["w"].T.astype(wd),
                      preferred_element_type=jnp.float32) + p["b"]
        assert out[task].shape == (B, out_dims[task]), (task, out[task].shape)
        assert jnp.allclose(out[task], ref, atol=2e-2, rtol=2e-2), task

    print("KERNEL_OK")
</pallas_src>

<mosaic_0001>
module attributes {stable_mosaic.version = 11 : i64} {
  func.func @_fused_forward_kernel(%arg0: i32, %arg1: i32, %arg2: memref<8x512xbf16, #tpu.memory_space<vmem>>, %arg3: memref<512x128xbf16, #tpu.memory_space<vmem>>, %arg4: memref<1x128xf32, #tpu.memory_space<vmem>>, %arg5: memref<128x128xbf16, #tpu.memory_space<vmem>>, %arg6: memref<1x128xf32, #tpu.memory_space<vmem>>, %arg7: memref<8x128xf32, #tpu.memory_space<vmem>>, %arg8: memref<8x128xf32, #tpu.memory_space<vmem>>) attributes {dimension_semantics = [#tpu.dimension_semantics<parallel>, #tpu.dimension_semantics<arbitrary>], iteration_bounds = array<i64: 1, 2>, scalar_prefetch = 0 : i64, scratch_operands = 1 : i64, tpu.core_type = #tpu.core_type<tc>, window_params = [{transform_indices = @transform_0, window_bounds = array<i64: 8, 512>}, {transform_indices = @transform_1, window_bounds = array<i64: 512, 128>}, {pipeline_mode = #tpu.pipeline_mode<synchronous>, transform_indices = @transform_2, window_bounds = array<i64: 1, 128>}, {pipeline_mode = #tpu.pipeline_mode<synchronous>, transform_indices = @transform_3, window_bounds = array<i64: 128, 128>}, {pipeline_mode = #tpu.pipeline_mode<synchronous>, transform_indices = @transform_4, window_bounds = array<i64: 1, 128>}, {transform_indices = @transform_5, window_bounds = array<i64: 8, 128>}]} {
    %c0_i32 = arith.constant 0 : i32
    %0 = arith.cmpi eq, %arg1, %c0_i32 : i32
    %1 = arith.extui %0 : i1 to i32
    %c0_i32_0 = arith.constant 0 : i32
    %2 = arith.cmpi ne, %1, %c0_i32_0 : i32
    scf.if %2 {
      %c0_9 = arith.constant 0 : index
      %c0_10 = arith.constant 0 : index
      %12 = vector.load %arg4[%c0_9, %c0_10] : memref<1x128xf32, #tpu.memory_space<vmem>>, vector<1x128xf32>
      %13 = vector.shape_cast %12 : vector<1x128xf32> to vector<1x128xf32>
      %14 = vector.broadcast %13 : vector<1x128xf32> to vector<8x128xf32>
      %c0_11 = arith.constant 0 : index
      %c0_12 = arith.constant 0 : index
      %15 = vector.load %arg8[%c0_11, %c0_12] : memref<8x128xf32, #tpu.memory_space<vmem>>, vector<8x128xf32>
      tpu.vector_store %arg8[%c0_11, %c0_12], %14 {strides = array<i32>} : memref<8x128xf32, #tpu.memory_space<vmem>>, vector<8x128xf32>,
    } else {
    }
    %c0 = arith.constant 0 : index
    %c0_1 = arith.constant 0 : index
    %3 = vector.load %arg8[%c0, %c0_1] : memref<8x128xf32, #tpu.memory_space<vmem>>, vector<8x128xf32>
    %c0_2 = arith.constant 0 : index
    %c0_3 = arith.constant 0 : index
    %4 = vector.load %arg2[%c0_2, %c0_3] : memref<8x512xbf16, #tpu.memory_space<vmem>>, vector<8x512xbf16>
    %c0_4 = arith.constant 0 : index
    %c0_5 = arith.constant 0 : index
    %5 = vector.load %arg3[%c0_4, %c0_5] : memref<512x128xbf16, #tpu.memory_space<vmem>>, vector<512x128xbf16>
    %cst = arith.constant dense<0.000000e+00> : vector<8x128xf32>
    %6 = tpu.matmul %4, %5, %cst {dimension_numbers = #tpu.dot_dimension_numbers<[1], [0], [0], [1], [0, 0, 1, 1], [], []>} : vector<8x512xbf16>, vector<512x128xbf16>, vector<8x128xf32> -> vector<8x128xf32>
    %7 = arith.addf %3, %6 : vector<8x128xf32>
    %c0_6 = arith.constant 0 : index
    %c0_7 = arith.constant 0 : index
    %8 = vector.load %arg8[%c0_6, %c0_7] : memref<8x128xf32, #tpu.memory_space<vmem>>, vector<8x128xf32>
    tpu.vector_store %arg8[%c0_6, %c0_7], %7 {strides = array<i32>} : memref<8x128xf32, #tpu.memory_space<vmem>>, vector<8x128xf32>,
    %c1_i32 = arith.constant 1 : i32
    %9 = arith.cmpi eq, %arg1, %c1_i32 : i32
    %10 = arith.extui %9 : i1 to i32
    %c0_i32_8 = arith.constant 0 : i32
    %11 = arith.cmpi ne, %10, %c0_i32_8 : i32
    scf.if %11 {
      %c0_9 = arith.constant 0 : index
      %c0_10 = arith.constant 0 : index
      %12 = vector.load %arg8[%c0_9, %c0_10] : memref<8x128xf32, #tpu.memory_space<vmem>>, vector<8x128xf32>
      %cst_11 = arith.constant 0.000000e+00 : f32
      %13 = vector.broadcast %cst_11 : f32 to vector<8x128xf32>
      %14 = arith.maximumf %12, %13 : vector<8x128xf32>
      %c0_12 = arith.constant 0 : index
      %c0_13 = arith.constant 0 : index
      %15 = vector.load %arg8[%c0_12, %c0_13] : memref<8x128xf32, #tpu.memory_space<vmem>>, vector<8x128xf32>
      tpu.vector_store %arg8[%c0_12, %c0_13], %14 {strides = array<i32>} : memref<8x128xf32, #tpu.memory_space<vmem>>, vector<8x128xf32>,
      %c0_14 = arith.constant 0 : index
      %c0_15 = arith.constant 0 : index
      %16 = vector.load %arg8[%c0_14, %c0_15] : memref<8x128xf32, #tpu.memory_space<vmem>>, vector<8x128xf32>
      %17 = arith.truncf %16 : vector<8x128xf32> to vector<8x128xbf16>
      %c0_16 = arith.constant 0 : index
      %c0_17 = arith.constant 0 : index
      %18 = vector.load %arg5[%c0_16, %c0_17] : memref<128x128xbf16, #tpu.memory_space<vmem>>, vector<128x128xbf16>
      %cst_18 = arith.constant dense<0.000000e+00> : vector<8x128xf32>
      %19 = tpu.matmul %17, %18, %cst_18 {dimension_numbers = #tpu.dot_dimension_numbers<[1], [0], [0], [1], [0, 0, 1, 1], [], []>} : vector<8x128xbf16>, vector<128x128xbf16>, vector<8x128xf32> -> vector<8x128xf32>
      %c0_19 = arith.constant 0 : index
      %c0_20 = arith.constant 0 : index
      %20 = vector.load %arg6[%c0_19, %c0_20] : memref<1x128xf32, #tpu.memory_space<vmem>>, vector<1x128xf32>
      %21 = vector.broadcast %20 : vector<1x128xf32> to vector<8x128xf32>
      %22 = arith.addf %19, %21 : vector<8x128xf32>
      %c0_21 = arith.constant 0 : index
      %c0_22 = arith.constant 0 : index
      %23 = vector.load %arg7[%c0_21, %c0_22] : memref<8x128xf32, #tpu.memory_space<vmem>>, vector<8x128xf32>
      tpu.vector_store %arg7[%c0_21, %c0_22], %22 {strides = array<i32>} : memref<8x128xf32, #tpu.memory_space<vmem>>, vector<8x128xf32>,
    } else {
    }
    return
  }
  func.func @transform_0(%arg0: i32, %arg1: i32) -> (i32, i32) {
    %c0_i32 = arith.constant 0 : i32
    return %arg0, %arg1 : i32, i32
  }
  func.func @transform_1(%arg0: i32, %arg1: i32) -> (i32, i32) {
    %c0_i32 = arith.constant 0 : i32
    %c0_i32_0 = arith.constant 0 : i32
    return %arg1, %c0_i32 : i32, i32
  }
  func.func @transform_2(%arg0: i32, %arg1: i32) -> (i32, i32) {
    %c0_i32 = arith.constant 0 : i32
    %c0_i32_0 = arith.constant 0 : i32
    %c0_i32_1 = arith.constant 0 : i32
    return %c0_i32, %c0_i32_0 : i32, i32
  }
  func.func @transform_3(%arg0: i32, %arg1: i32) -> (i32, i32) {
    %c0_i32 = arith.constant 0 : i32
    %c0_i32_0 = arith.constant 0 : i32
    %c0_i32_1 = arith.constant 0 : i32
    return %c0_i32, %c0_i32_0 : i32, i32
  }
  func.func @transform_4(%arg0: i32, %arg1: i32) -> (i32, i32) {
    %c0_i32 = arith.constant 0 : i32
    %c0_i32_0 = arith.constant 0 : i32
    %c0_i32_1 = arith.constant 0 : i32
    return %c0_i32, %c0_i32_0 : i32, i32
  }
  func.func @transform_5(%arg0: i32, %arg1: i32) -> (i32, i32) {
    %c0_i32 = arith.constant 0 : i32
    %c0_i32_0 = arith.constant 0 : i32
    return %arg0, %c0_i32 : i32, i32
  }
}

module attributes {stable_mosaic.version = 11 : i64} {
  func.func @_fused_forward_kernel(%arg0: i32, %arg1: i32, %arg2: memref<8x512xbf16, #tpu.memory_space<vmem>>, %arg3: memref<512x128xbf16, #tpu.memory_space<vmem>>, %arg4: memref<1x128xf32, #tpu.memory_space<vmem>>, %arg5: memref<128x128xbf16, #tpu.memory_space<vmem>>, %arg6: memref<1x128xf32, #tpu.memory_space<vmem>>, %arg7: memref<8x128xf32, #tpu.memory_space<vmem>>, %arg8: memref<8x128xf32, #tpu.memory_space<vmem>>) attributes {dimension_semantics = [#tpu.dimension_semantics<parallel>, #tpu.dimension_semantics<arbitrary>], iteration_bounds = array<i64: 1, 2>, scalar_prefetch = 0 : i64, scratch_operands = 1 : i64, tpu.core_type = #tpu.core_type<tc>, window_params = [{transform_indices = @transform_0, window_bounds = array<i64: 8, 512>}, {transform_indices = @transform_1, window_bounds = array<i64: 512, 128>}, {pipeline_mode = #tpu.pipeline_mode<synchronous>, transform_indices = @transform_2, window_bounds = array<i64: 1, 128>}, {pipeline_mode = #tpu.pipeline_mode<synchronous>, transform_indices = @transform_3, window_bounds = array<i64: 128, 128>}, {pipeline_mode = #tpu.pipeline_mode<synchronous>, transform_indices = @transform_4, window_bounds = array<i64: 1, 128>}, {transform_indices = @transform_5, window_bounds = array<i64: 8, 128>}]} {
    %c0_i32 = arith.constant 0 : i32
    %0 = arith.cmpi eq, %arg1, %c0_i32 : i32
    %1 = arith.extui %0 : i1 to i32
    %c0_i32_0 = arith.constant 0 : i32
    %2 = arith.cmpi ne, %1, %c0_i32_0 : i32
    scf.if %2 {
      %c0_9 = arith.constant 0 : index
      %c0_10 = arith.constant 0 : index
      %12 = vector.load %arg4[%c0_9, %c0_10] : memref<1x128xf32, #tpu.memory_space<vmem>>, vector<1x128xf32>
      %13 = vector.shape_cast %12 : vector<1x128xf32> to vector<1x128xf32>
      %14 = vector.broadcast %13 : vector<1x128xf32> to vector<8x128xf32>
      %c0_11 = arith.constant 0 : index
      %c0_12 = arith.constant 0 : index
      %15 = vector.load %arg8[%c0_11, %c0_12] : memref<8x128xf32, #tpu.memory_space<vmem>>, vector<8x128xf32>
      tpu.vector_store %arg8[%c0_11, %c0_12], %14 {strides = array<i32>} : memref<8x128xf32, #tpu.memory_space<vmem>>, vector<8x128xf32>,
    } else {
    }
    %c0 = arith.constant 0 : index
    %c0_1 = arith.constant 0 : index
    %3 = vector.load %arg8[%c0, %c0_1] : memref<8x128xf32, #tpu.memory_space<vmem>>, vector<8x128xf32>
    %c0_2 = arith.constant 0 : index
    %c0_3 = arith.constant 0 : index
    %4 = vector.load %arg2[%c0_2, %c0_3] : memref<8x512xbf16, #tpu.memory_space<vmem>>, vector<8x512xbf16>
    %c0_4 = arith.constant 0 : index
    %c0_5 = arith.constant 0 : index
    %5 = vector.load %arg3[%c0_4, %c0_5] : memref<512x128xbf16, #tpu.memory_space<vmem>>, vector<512x128xbf16>
    %cst = arith.constant dense<0.000000e+00> : vector<8x128xf32>
    %6 = tpu.matmul %4, %5, %cst {dimension_numbers = #tpu.dot_dimension_numbers<[1], [0], [0], [1], [0, 0, 1, 1], [], []>} : vector<8x512xbf16>, vector<512x128xbf16>, vector<8x128xf32> -> vector<8x128xf32>
    %7 = arith.addf %3, %6 : vector<8x128xf32>
    %c0_6 = arith.constant 0 : index
    %c0_7 = arith.constant 0 : index
    %8 = vector.load %arg8[%c0_6, %c0_7] : memref<8x128xf32, #tpu.memory_space<vmem>>, vector<8x128xf32>
    tpu.vector_store %arg8[%c0_6, %c0_7], %7 {strides = array<i32>} : memref<8x128xf32, #tpu.memory_space<vmem>>, vector<8x128xf32>,
    %c1_i32 = arith.constant 1 : i32
    %9 = arith.cmpi eq, %arg1, %c1_i32 : i32
    %10 = arith.extui %9 : i1 to i32
    %c0_i32_8 = arith.constant 0 : i32
    %11 = arith.cmpi ne, %10, %c0_i32_8 : i32
    scf.if %11 {
      %c0_9 = arith.constant 0 : index
      %c0_10 = arith.constant 0 : index
      %12 = vector.load %arg8[%c0_9, %c0_10] : memref<8x128xf32, #tpu.memory_space<vmem>>, vector<8x128xf32>
      %cst_11 = arith.constant 0.000000e+00 : f32
      %13 = vector.broadcast %cst_11 : f32 to vector<8x128xf32>
      %14 = arith.maximumf %12, %13 : vector<8x128xf32>
      %c0_12 = arith.constant 0 : index
      %c0_13 = arith.constant 0 : index
      %15 = vector.load %arg8[%c0_12, %c0_13] : memref<8x128xf32, #tpu.memory_space<vmem>>, vector<8x128xf32>
      tpu.vector_store %arg8[%c0_12, %c0_13], %14 {strides = array<i32>} : memref<8x128xf32, #tpu.memory_space<vmem>>, vector<8x128xf32>,
      %c0_14 = arith.constant 0 : index
      %c0_15 = arith.constant 0 : index
      %16 = vector.load %arg8[%c0_14, %c0_15] : memref<8x128xf32, #tpu.memory_space<vmem>>, vector<8x128xf32>
      %17 = arith.truncf %16 : vector<8x128xf32> to vector<8x128xbf16>
      %c0_16 = arith.constant 0 : index
      %c0_17 = arith.constant 0 : index
      %18 = vector.load %arg5[%c0_16, %c0_17] : memref<128x128xbf16, #tpu.memory_space<vmem>>, vector<128x128xbf16>
      %cst_18 = arith.constant dense<0.000000e+00> : vector<8x128xf32>
      %19 = tpu.matmul %17, %18, %cst_18 {dimension_numbers = #tpu.dot_dimension_numbers<[1], [0], [0], [1], [0, 0, 1, 1], [], []>} : vector<8x128xbf16>, vector<128x128xbf16>, vector<8x128xf32> -> vector<8x128xf32>
      %c0_19 = arith.constant 0 : index
      %c0_20 = arith.constant 0 : index
      %20 = vector.load %arg6[%c0_19, %c0_20] : memref<1x128xf32, #tpu.memory_space<vmem>>, vector<1x128xf32>
      %21 = vector.broadcast %20 : vector<1x128xf32> to vector<8x128xf32>
      %22 = arith.addf %19, %21 : vector<8x128xf32>
      %c0_21 = arith.constant 0 : index
      %c0_22 = arith.constant 0 : index
      %23 = vector.load %arg7[%c0_21, %c0_22] : memref<8x128xf32, #tpu.memory_space<vmem>>, vector<8x128xf32>
      tpu.vector_store %arg7[%c0_21, %c0_22], %22 {strides = array<i32>} : memref<8x128xf32, #tpu.memory_space<vmem>>, vector<8x128xf32>,
    } else {
    }
    return
  }
  func.func @transform_0(%arg0: i32, %arg1: i32) -> (i32, i32) {
    %c0_i32 = arith.constant 0 : i32
    return %arg0, %arg1 : i32, i32
  }
  func.func @transform_1(%arg0: i32, %arg1: i32) -> (i32, i32) {
    %c0_i32 = arith.constant 0 : i32
    %c0_i32_0 = arith.constant 0 : i32
    return %arg1, %c0_i32 : i32, i32
  }
  func.func @transform_2(%arg0: i32, %arg1: i32) -> (i32, i32) {
    %c0_i32 = arith.constant 0 : i32
    %c0_i32_0 = arith.constant 0 : i32
    %c0_i32_1 = arith.constant 0 : i32
    return %c0_i32, %c0_i32_0 : i32, i32
  }
  func.func @transform_3(%arg0: i32, %arg1: i32) -> (i32, i32) {
    %c0_i32 = arith.constant 0 : i32
    %c0_i32_0 = arith.constant 0 : i32
    %c0_i32_1 = arith.constant 0 : i32
    return %c0_i32, %c0_i32_0 : i32, i32
  }
  func.func @transform_4(%arg0: i32, %arg1: i32) -> (i32, i32) {
    %c0_i32 = arith.constant 0 : i32
    %c0_i32_0 = arith.constant 0 : i32
    %c0_i32_1 = arith.constant 0 : i32
    return %c0_i32, %c0_i32_0 : i32, i32
  }
  func.func @transform_5(%arg0: i32, %arg1: i32) -> (i32, i32) {
    %c0_i32 = arith.constant 0 : i32
    %c0_i32_0 = arith.constant 0 : i32
    return %arg0, %c0_i32 : i32, i32
  }
}

</mosaic_0001>

<bundles_post_ra>
// kernel: tpu_custom_call.1
= control target key start
LH: loop header
LB: loop body
LE: loop exit
PB: predicated region body
PF: predicated region fallthrough
CT: control target
= control target key end

     0   :  { %10 = vsyncpa [#allocation4], 0  ;;  %s1654_s0 = inlined_call_operand.hbm [shape: bf16[8,1024], index: 0, kind: input, shape index: {}]   ;;  %s1655_s1 = inlined_call_operand.hbm [shape: bf16[1024,128], index: 1, kind: input, shape index: {}]   ;;  %s1656_s2 = inlined_call_operand.vmem [shape: f32[1,128], index: 2, kind: input, shape index: {}]   ;;  %s1657_s3 = inlined_call_operand.hbm [shape: bf16[128,128], index: 3, kind: input, shape index: {}]   ;;  %s1658_s4 = inlined_call_operand.vmem [shape: f32[1,128], index: 4, kind: input, shape index: {}]   ;;  %s1659_s5 = inlined_call_operand.hbm [shape: f32[8,128], index: 5, kind: output, shape index: {}]  }
   0x1   :  { %12 = vsyncpa [#allocation4 + $0x1], 0 }
   0x2   :  { %13 = vsyncpa [#allocation7], 0 }
   0x3   :  { %15 = vsyncpa [#allocation7 + $0x1], 0 }
   0x4   :  { %16 = vsyncpa [#allocation5], 0  ;;  %s1383_s18 = smov 0   ;;  %s1385_s19 = smov 0  }
   0x5   :  { %s1387_s20 = smov 0   ;;  %s1389_s21 = smov 0  }
   0x6   :  { %s1391_s22 = smov 0   ;;  %s1393_s23 = smov 0  }
   0x7 LB: > { %s1412_s24 = sadd.s32 4294967295, %s1343_s23   ;;  %p56_p0 = scmp.ne.s32.totalorder %s1327_s19, %s1323_s18  ;;  %s1343_s23 = sphi %s1393_s23, %s22_s23   ;;  %s1339_s22 = sphi %s1391_s22, %s1679_s22   ;;  %s1335_s21 = sphi %s1389_s21, %s1678_s21   ;;  %s1331_s20 = sphi %s1387_s20, %s1677_s20   ;;  %s1327_s19 = sphi %s1385_s19, %s1676_s19   ;;  %s1323_s18 = sphi %s1383_s18, %s1675_s18  }
   0x8   : > { %p1660_p1 = scmp.eq.s32.totalorder %s1412_s24, 0  ;;  %p901_p2 = scmp.ge.s32.totalorder %s1343_s23, 1 }
   0x9   : > { %p182_p3 = scmp.lt.s32.totalorder %s1343_s23, 3  ;;  %s1345_s27 = smov [#allocation8]  }
   0xa   : > { %p1420_p4 = por %p1660_p1, %p56_p0  ;;  %s197_s28 = sshll.u32 %s1345_s27, 4  ;;  %s198_s28 = int_to_ptr.vmem [resolvable:$true] %s197_s28 }
   0xb   : > { %p1424_p5 = pnand %p901_p2, %p182_p3  ;;  %s31_s30 = sadd.s32 1, %s1339_s22 }
   0xc   : > { %s1665_s25 = scalar_select %p1420_p4, 1, 0 }
   0xd   : > { %s1666_s26 = scalar_select %p1424_p5, 1, 0 }
   0xe   : > { %p1053_p6 = pneg %p1424_p5  ;;  %s1167_s8 = scalar_lea.hbm %s1657_s3, 1024 }
   0xf   : > { %p1168_p8 = scmp.ne.s32.totalorder %s1657_s3, %s1167_s8  ;;  %p1174_p12 = scmp.lt.u32.totalorder %s1167_s8, %s1657_s3 }
  0x10   : > { %p1432_p7 = pnand %p1053_p6, %p1660_p1 }
  0x12   : > { %p1169_p9 = pneg %p1432_p7 }
  0x14   : > { %p1170_p10 = pnand %p1169_p9, %p1168_p8 }
  0x16   : > { %p1171_p11 = pneg %p1170_p10 }
  0x18   : > { %p1176_p13 = pnand %p1174_p12, %p1171_p11 }
  0x1a   : > { %1179 = shalt.err (!%p1176_p13)
}
  0x1b   : > { %s1180_s13 = scalar_lea.vmem %s198_s28, 1024  ;;  %p1188_p6 = scmp.lt.s32.totalorder %s198_s28, %s198_s28 }
  0x1c   : > { %p1181_p0 = scmp.ne.s32.totalorder %s198_s28, %s1180_s13  ;;  %p1189_p1 = scmp.lt.s32.totalorder %s1180_s13, %s1180_s13 }
  0x1e   : > { %p1183_p2 = pnand %p1181_p0, %p1169_p9  ;;  %p1190_p4 = por %p1189_p1, %p1188_p6 }
  0x20   : > { %p1184_p3 = pneg %p1183_p2 }
  0x22   : > { %p1191_p5 = pnand %p1190_p4, %p1184_p3 }
  0x24   : > { %1194 = shalt.err (!%p1191_p5)
}
  0x25   : > { %s1663_s14 = smov 64   ;;  %s1664_s15 = smov 4  }
  0x26   : > { %1056 = dma.hbm_to_vmem [thread:$0]  (!%p1432_p7), %s1657_s3, 1024, %s198_s28, [#allocation7], %s1663_s14, %s1663_s14, %s1664_s15  }
  0x27   : > { %p32_p1 = scmp.ge.s32.totalorder %s31_s30, 2  ;;  %s43_s18 = sadd.s32 1, %s1331_s20 }
  0x28   : > { %p50_p4 = scmp.ne.s32.totalorder %s1331_s20, %s1327_s19  ;;  %p51_p5 = scmp.eq.s32.totalorder %s1343_s23, 0 }
  0x29   : > { %s1681_s30 = smov (%p32_p1, %s31_s30), 0  ;;  %p1065_p9 = scmp.lt.s32.totalorder %s1343_s23, 2 }
  0x2a   : > { %p52_p8 = por %p51_p5, %p50_p4  ;;  %s39_s27 = ssub.s32 %s1339_s22, %s1681_s30 }
  0x2b   : > { %s1466_s6 = sand.u32 1, %s1331_s20   ;;  %p41_p10 = scmp.eq.s32.totalorder %s39_s27, 0 }
  0x2c   : > { %s904_s29 = sshll.u32 %s1466_s6, 4  ;;  %s966_s7 = sshll.u32 %s1339_s22, 8 }
  0x2d   : > { %s1471_s8 = scalar_select %p41_p10, %s1331_s20, %s43_s18  }
  0x2e   : > { %s1476_s10 = scalar_lea.hbm %s1654_s0, %s966_s7  ;;  %s218_s11 = scalar_lea.vmem [#allocation3], %s904_s29 }
  0x2f   : > { %s228_s12 = sshll.u32 %s218_s11, 4  ;;  %p1478_p7 = pnand %p1065_p9, %p52_p8  ;;  %s1482_s12 = int_to_ptr.vmem [resolvable:$true] %s228_s12 }
  0x30   : > { %s907_s16 = sshll.u32 %s1466_s6, 8  ;;  %s215_s17 = scalar_lea.sflag [#allocation4], %s1466_s6 }
  0x31   : > { %s1195_s18 = scalar_lea.hbm %s1476_s10, 256  ;;  %p1197_p12 = pneg %p1478_p7 }
  0x32   : > { %p1196_p11 = scmp.ne.s32.totalorder %s1476_s10, %s1195_s18  ;;  %s1200_s7 = scalar_lea.hbm %s1654_s0, 512 }
  0x33   : > { %p1201_p2 = scmp.lt.u32.totalorder %s1476_s10, %s1654_s0  ;;  %p1202_p3 = scmp.lt.u32.totalorder %s1200_s7, %s1195_s18 }
  0x34   : > { %p1198_p13 = pnand %p1197_p12, %p1196_p11  ;;  %p1204_p1 = scmp.lt.u32.totalorder %s1195_s18, %s1476_s10 }
  0x35   : > { %p1203_p6 = por %p1202_p3, %p1201_p2 }
  0x36   : > { %p1199_p0 = pneg %p1198_p13 }
  0x37   : > { %p1205_p4 = por %p1204_p1, %p1203_p6 }
  0x39   : > { %p1206_p5 = pnand %p1205_p4, %p1199_p0 }
  0x3b   : > { %1209 = shalt.err (!%p1206_p5)
}
  0x3c   : > { %s1210_s11 = scalar_lea.vmem %s1482_s12, 256  ;;  %s1348_s27 = smov [#allocation3]  }
  0x3d   : > { %p1211_p8 = scmp.ne.s32.totalorder %s1482_s12, %s1210_s11  ;;  %s1215_s29 = sshll.u32 %s1348_s27, 4  ;;  %s1216_s29 = int_to_ptr.vmem [resolvable:$false] %s1215_s29 }
  0x3e   : > { %s1217_s28 = scalar_lea.vmem %s1216_s29, 512  ;;  %p1218_p11 = scmp.lt.s32.totalorder %s1482_s12, %s1216_s29 }
  0x3f   : > { %p1213_p9 = pnand %p1211_p8, %p1197_p12  ;;  %p1219_p13 = scmp.lt.s32.totalorder %s1217_s28, %s1210_s11 }
  0x41   : > { %p1214_p10 = pneg %p1213_p9  ;;  %p1220_p2 = por %p1219_p13, %p1218_p11 }
  0x43   : > { %p1221_p3 = pnand %p1220_p2, %p1214_p10 }
  0x45   : > { %1224 = shalt.err (!%p1221_p3)
}
  0x46   : > { %1060 = dma.hbm_to_vmem [thread:$0]  (!%p1478_p7), %s1476_s10, 256, %s1482_s12, %s215_s17  }
  0x47   : > { %s967_s18 = sshll.u32 %s1339_s22, 12  ;;  %s239_s7 = scalar_lea.vmem [#allocation6], %s907_s16 }
  0x48   : > { %s246_s9 = sshll.u32 %s239_s7, 4  ;;  %s235_s27 = sand.u32 1, %s1343_s23   ;;  %s1514_s9 = int_to_ptr.vmem [resolvable:$true] %s246_s9 }
  0x49   : > { %s1520_s28 = scalar_lea.hbm %s1655_s1, %s967_s18  ;;  %s1522_s14 = scalar_lea.sflag [#allocation7], %s235_s27 }
  0x4a   : > { %s1225_s15 = scalar_lea.hbm %s1520_s28, 4096  ;;  %s1230_s12 = scalar_lea.hbm %s1655_s1, 8192 }
  0x4b   : > { %p1226_p0 = scmp.ne.s32.totalorder %s1520_s28, %s1225_s15  ;;  %p1231_p4 = scmp.lt.u32.totalorder %s1520_s28, %s1655_s1 }
  0x4c   : > { %p1232_p5 = scmp.lt.u32.totalorder %s1230_s12, %s1225_s15  ;;  %p1234_p9 = scmp.lt.u32.totalorder %s1225_s15, %s1520_s28 }
  0x4d   : > { %p1228_p6 = pnand %p1226_p0, %p1197_p12 }
  0x4e   : > { %p1233_p8 = por %p1232_p5, %p1231_p4 }
  0x4f   : > { %p1229_p1 = pneg %p1228_p6 }
  0x50   : > { %p1235_p10 = por %p1234_p9, %p1233_p8 }
  0x52   : > { %p1236_p11 = pnand %p1235_p10, %p1229_p1 }
  0x54   : > { %1239 = shalt.err (!%p1236_p11)
}
  0x55   : > { %s1240_s18 = scalar_lea.vmem %s1514_s9, 4096  ;;  %s1349_s7 = smov [#allocation6]  }
  0x56   : > { %p1241_p13 = scmp.ne.s32.totalorder %s1514_s9, %s1240_s18  ;;  %s1245_s27 = sshll.u32 %s1349_s7, 4  ;;  %s1246_s27 = int_to_ptr.vmem [resolvable:$false] %s1245_s27 }
  0x57   : > { %s1247_s11 = scalar_lea.vmem %s1246_s27, 8192  ;;  %p1248_p0 = scmp.lt.s32.totalorder %s1514_s9, %s1246_s27 }
  0x58   : > { %p1243_p2 = pnand %p1241_p13, %p1197_p12  ;;  %p1249_p6 = scmp.lt.s32.totalorder %s1247_s11, %s1240_s18 }
  0x5a   : > { %p1244_p3 = pneg %p1243_p2  ;;  %p1250_p4 = por %p1249_p6, %p1248_p0 }
  0x5c   : > { %p1251_p5 = pnand %p1250_p4, %p1244_p3 }
  0x5e   : > { %1254 = shalt.err (!%p1251_p5)
}
  0x5f   : > { %s1669_s15 = smov 4   ;;  %s1670_s29 = smov 64  }
  0x60   : > { %1063 = dma.hbm_to_vmem [thread:$0]  (!%p1478_p7), %s1520_s28, 4096, %s1514_s9, %s1522_s14, %s1670_s29, %s1670_s29, %s1669_s15  }
  0x61   : > { %p1671_p12 = scmp.ne.s32.totalorder %s1666_s26, 0 }
  0x62   : > { %s260_s6 = sand.u32 (!%p1671_p12), 1, %s1327_s19   ;;  %p1672_p1 = scmp.ne.s32.totalorder (!%p1671_p12), %s1665_s25, 0 }
  0x63   : > { %258 = sbr.rel (%p1671_p12) target bundleno = 628 (0x274), region = 40  ;;  %s911_s10 = sshll.u32 (!%p1671_p12), %s260_s6, 4 }
  0x64   : > { %s261_s12 = scalar_lea.sflag (!%p1671_p12), [#allocation4], %s260_s6  ;;  %s1554_s16 = scalar_lea.vmem (!%p1671_p12), [#allocation3], %s911_s10 }
  0x6a   : > { %1306 = dma.done.wait (%p1672_p1), %s261_s12, 256  }
  0x6b   : > { %1308 = vsyncadd (%p1672_p1), %s261_s12, 4294967040  ;;  %s269_s13 = sand.u32 1, %s1412_s24   ;;  %s912_s17 = sshll.u32 %s260_s6, 8 }
  0x6c   : > { %s270_s14 = scalar_lea.sflag [#allocation7], %s269_s13  ;;  %s1561_s9 = scalar_lea.vmem [#allocation6], %s912_s17 }
  0x6d   : > { %1310 = dma.done.wait (%p1672_p1), %s270_s14, 4096  }
  0x6e   : > { %1312 = vsyncadd (%p1672_p1), %s270_s14, 4294963200  ;;  %p1673_p7 = scmp.eq.s32.totalorder %s1412_s24, 0 }
  0x70   : > { %1314 = dma.done.wait (%p1673_p7), [#allocation7], 1024   ;;  %p1674_p8 = pmov %p1673_p7 }
  0x71   : > { %p914_p9 = scmp.ne.s32.totalorder %s1335_s21, 0 }
  0x72   : > { %1316 = vsyncadd (%p1674_p8), [#allocation7], 4294966272  ;;  %v915_v0 = vld [vmem:[%s1656_s2] ss:$0 sm:$0xff] (!%p914_p9) }
  0x73   : > { %310 = sbr.rel (%p914_p9) target bundleno = 122 (0x7a), region = 56  ;;  %318 = vst [vmem:[#allocation2] sm:$0xff] (!%p914_p9), %v915_v0 }
  0x7a PF: > { %v1123_v1 = vld [vmem:[%s1561_s9 + $0x40] sm:$0xff]   ;;  %v1127_v5 = vld [vmem:[%s1561_s9 + $0x48] sm:$0xff]   ;;  %v1131_v9 = vld [vmem:[%s1561_s9 + $0x50] sm:$0xff]   ;;  %p952_p10 = scmp.ne.s32.totalorder %s1335_s21, 1 }
  0x7b   : > { %v1124_v2 = vld [vmem:[%s1561_s9 + $0xc0] sm:$0xff]   ;;  %968 = vmatprep.subr.bf16.mxu0 %v1123_v1  ;;  %v1128_v6 = vld [vmem:[%s1561_s9 + $0xc8] sm:$0xff]   ;;  %v1132_v10 = vld [vmem:[%s1561_s9 + $0xd0] sm:$0xff]   ;;  %v1350_v53 = vmov (!%p952_p10), 0.0   ;;  %vm1351_vm0 = vmmov (!%p952_p10), 0  }
  0x7c   : > { %v1125_v3 = vld [vmem:[%s1561_s9] sm:$0xff]   ;;  %990 = vmatprep.subr.bf16.mxu1 %v1124_v2  ;;  %v1129_v7 = vld [vmem:[%s1561_s9 + $0x8] sm:$0xff]   ;;  %v1133_v11 = vld [vmem:[%s1561_s9 + $0x10] sm:$0xff]  }
  0x7d   : > { %v1126_v4 = vld [vmem:[%s1561_s9 + $0x80] sm:$0xff]   ;;  %969 = vmatpush3.bf16.msra.mxu0 %v1125_v3  ;;  %v1130_v8 = vld [vmem:[%s1561_s9 + $0x88] sm:$0xff]   ;;  %v1134_v12 = vld [vmem:[%s1561_s9 + $0x90] sm:$0xff]  }
  0x7e   : > { %991 = vmatpush3.bf16.msra.mxu1 %v1126_v4  ;;  %970 = vmatprep.subr.bf16.mxu0 %v1127_v5  ;;  %v1135_v13 = vld [vmem:[%s1561_s9 + $0x58] sm:$0xff]   ;;  %v1139_v17 = vld [vmem:[%s1561_s9 + $0x60] sm:$0xff]   ;;  %v1143_v21 = vld [vmem:[%s1561_s9 + $0x68] sm:$0xff]  }
  0x7f   : > { %992 = vmatprep.subr.bf16.mxu1 %v1128_v6  ;;  %v1136_v14 = vld [vmem:[%s1561_s9 + $0xd8] sm:$0xff]   ;;  %v1140_v18 = vld [vmem:[%s1561_s9 + $0xe0] sm:$0xff]   ;;  %v1144_v22 = vld [vmem:[%s1561_s9 + $0xe8] sm:$0xff]  }
  0x80   : > { %v1137_v15 = vld [vmem:[%s1561_s9 + $0x18] sm:$0xff]   ;;  %v1141_v19 = vld [vmem:[%s1561_s9 + $0x20] sm:$0xff]   ;;  %v1145_v23 = vld [vmem:[%s1561_s9 + $0x28] sm:$0xff]  }
  0x81   : > { %971 = vmatpush3.bf16.msra.mxu0 %v1129_v7  ;;  %v1138_v16 = vld [vmem:[%s1561_s9 + $0x98] sm:$0xff]   ;;  %v1142_v20 = vld [vmem:[%s1561_s9 + $0xa0] sm:$0xff]   ;;  %v1146_v24 = vld [vmem:[%s1561_s9 + $0xa8] sm:$0xff]  }
  0x82   : > { %993 = vmatpush3.bf16.msra.mxu1 %v1130_v8  ;;  %972 = vmatprep.subr.bf16.mxu0 %v1131_v9  ;;  %v1147_v25 = vld [vmem:[%s1561_s9 + $0x70] sm:$0xff]   ;;  %v1151_v29 = vld [vmem:[%s1561_s9 + $0x78] sm:$0xff]   ;;  %v1159_v52 = vld [vmem:[#allocation8] sm:$0xff] (!%p952_p10)  }
  0x83   : > { %994 = vmatprep.subr.bf16.mxu1 %v1132_v10  ;;  %v1148_v26 = vld [vmem:[%s1561_s9 + $0xf0] sm:$0xff]   ;;  %v1152_v30 = vld [vmem:[%s1561_s9 + $0xf8] sm:$0xff]   ;;  %v1160_v54 = vld [vmem:[#allocation8 + $0x8] sm:$0xff] (!%p952_p10)  }
  0x84   : > { %v1149_v27 = vld [vmem:[%s1561_s9 + $0x30] sm:$0xff]   ;;  %v1153_v31 = vld [vmem:[%s1561_s9 + $0x38] sm:$0xff]   ;;  %v1163_v59 = vld [vmem:[#allocation8 + $0x20] sm:$0xff] (!%p952_p10)  }
  0x85   : > { %973 = vmatpush3.bf16.msra.mxu0 %v1133_v11  ;;  %v1150_v28 = vld [vmem:[%s1561_s9 + $0xb0] sm:$0xff]   ;;  %v1154_v32 = vld [vmem:[%s1561_s9 + $0xb8] sm:$0xff]   ;;  %v1164_v60 = vld [vmem:[#allocation8 + $0x28] sm:$0xff] (!%p952_p10)  }
  0x86   : > { %995 = vmatpush3.bf16.msra.mxu1 %v1134_v12  ;;  %974 = vmatprep.subr.bf16.mxu0 %v1135_v13  ;;  %v320_v33 = vld [vmem:[%s1554_s16] sm:$0xff]  ;;  %v321_v34 = vld [vmem:[%s1554_s16 + $0x8] sm:$0xff] }
  0x87   : > { %996 = vmatprep.subr.bf16.mxu1 %v1136_v14  ;;  %v916_v35 = vcombine.low %v320_v33, %v320_v33  ;;  %v917_v36 = vcombine.high %v320_v33, %v320_v33  ;;  %v918_v37 = vcombine.low %v321_v34, %v321_v34  ;;  %v919_v38 = vcombine.high %v321_v34, %v321_v34  ;;  %v319_v47 = vld [vmem:[#allocation2] sm:$0xff]  ;;  %v1161_v55 = vld [vmem:[#allocation8 + $0x10] sm:$0xff] (!%p952_p10)  }
  0x88   : > { %v1162_v58 = vld [vmem:[#allocation8 + $0x18] sm:$0xff] (!%p952_p10)   ;;  %v1165_v61 = vld [vmem:[#allocation8 + $0x30] sm:$0xff] (!%p952_p10)  }
  0x89   : > { %975 = vmatpush3.bf16.msra.mxu0 %v1137_v15  ;;  %624 = vmatprep.mubr.bf16.mxu0 %v917_v36  ;;  %v1166_v62 = vld [vmem:[#allocation8 + $0x38] sm:$0xff] (!%p952_p10)  }
  0x8a   : > { %997 = vmatpush3.bf16.msra.mxu1 %v1138_v16  ;;  %976 = vmatprep.subr.bf16.mxu0 %v1139_v17  ;;  %v953_v0 = vld [vmem:[%s1658_s4] ss:$0 sm:$0xff] (!%p952_p10) }
  0x8b   : > { %998 = vmatprep.subr.bf16.mxu1 %v1140_v18  ;;  %664 = vmatprep.mubr.bf16.mxu1 %v919_v38 }
  0x8d   : > { %977 = vmatpush3.bf16.msra.mxu0 %v1141_v19 }
  0x8e   : > { %999 = vmatpush3.bf16.msra.mxu1 %v1142_v20  ;;  %978 = vmatprep.subr.bf16.mxu0 %v1143_v21 }
  0x8f   : > { %1000 = vmatprep.subr.bf16.mxu1 %v1144_v22 }
  0x91   : > { %979 = vmatpush3.bf16.msra.mxu0 %v1145_v23 }
  0x92   : > { %1001 = vmatpush3.bf16.msra.mxu1 %v1146_v24  ;;  %980 = vmatprep.subr.bf16.mxu0 %v1147_v25 }
  0x93   : > { %1002 = vmatprep.subr.bf16.mxu1 %v1148_v26 }
  0x95   : > { %981 = vmatpush3.bf16.msra.mxu0 %v1149_v27 }
  0x96   : > { %1003 = vmatpush3.bf16.msra.mxu1 %v1150_v28  ;;  %982 = vmatprep.subr.bf16.mxu0 %v1151_v29 }
  0x97   : > { %1004 = vmatprep.subr.bf16.mxu1 %v1152_v30 }
  0x99   : > { %983 = vmatpush3.bf16.msra.mxu0 %v1153_v31 }
  0x9a   : > { %1005 = vmatpush3.bf16.msra.mxu1 %v1154_v32  ;;  %1021 = vmatprep.subr.bf16.mxu0 (!%p952_p10), %v1350_v53 }
  0x9c   : > { %625 = vmatmul.mubr.bf16.vlgmr.msra.gmra.mrb[0].mxu0 %v916_v35 }
  0x9d   : > { %665 = vmatmul.mubr.bf16.vlgmr.msra.gmra.mrb[0].mxu1 %v918_v37  ;;  %1022 = vmatpush3.bf16.msra.mxu0 (!%p952_p10), %v1159_v52 }
  0x9e   : > { %1037 = vmatprep.mubr.msk.bf16.mxu0 (!%p952_p10), %vm1351_vm0, %v1350_v53  ;;  %1023 = vmatprep.subr.bf16.mxu0 (!%p952_p10), %v1350_v53 }
  0xa1   : > { %1024 = vmatpush3.bf16.msra.mxu0 (!%p952_p10), %v1160_v54 }
  0xa2   : > { %1025 = vmatprep.subr.bf16.mxu0 (!%p952_p10), %v1350_v53 }
  0xa5   : > { %1026 = vmatpush3.bf16.msra.mxu0 (!%p952_p10), %v1161_v55 }
  0xa6   : > { %1027 = vmatprep.subr.bf16.mxu0 (!%p952_p10), %v1350_v53 }
  0xa9   : > { %1028 = vmatpush3.bf16.msra.mxu0 (!%p952_p10), %v1162_v58 }
  0xaa   : > { %1029 = vmatprep.subr.bf16.mxu0 (!%p952_p10), %v1350_v53 }
  0xad   : > { %1030 = vmatpush3.bf16.msra.mxu0 (!%p952_p10), %v1163_v59 }
  0xae   : > { %1031 = vmatprep.subr.bf16.mxu0 (!%p952_p10), %v1350_v53 }
  0xb1   : > { %1032 = vmatpush3.bf16.msra.mxu0 (!%p952_p10), %v1164_v60 }
  0xb2   : > { %1033 = vmatprep.subr.bf16.mxu0 (!%p952_p10), %v1350_v53 }
  0xb5   : > { %1034 = vmatpush3.bf16.msra.mxu0 (!%p952_p10), %v1165_v61 }
  0xb6   : > { %1035 = vmatprep.subr.bf16.mxu0 (!%p952_p10), %v1350_v53 }
  0xb9   : > { %1036 = vmatpush3.bf16.msra.mxu0 (!%p952_p10), %v1166_v62 }
 0x16f   : > { %v984_v39 = vpop.f32.mrb[0].mxu0 }
 0x170   : > { %v1006_v40 = vpop.f32.mrb[0].mxu1  ;;  %v985_v41 = vpop.f32.mrb[1].mxu0 }
 0x171   : > { %v1007_v42 = vpop.f32.mrb[1].mxu1  ;;  %v986_v43 = vadd.f32 %v985_v41, %v984_v39  ;;  %v987_v45 = vpop.f32.mrb[2].mxu0 }
 0x172   : > { %v1008_v44 = vadd.f32 %v1007_v42, %v1006_v40  ;;  %v1009_v46 = vpop.f32.mrb[2].mxu1  ;;  %v988_v48 = vpop.f32.mrb[3].mxu0  ;;  %677 = sbr.rel (%p952_p10) target bundleno = 603 (0x25b), region = 60 }
 0x173   : > { %v1010_v49 = vpop.f32.mrb[3].mxu1 }
 0x174   : > { %v667_v50 = vadd.f32 %v1008_v44, %v986_v43 }
 0x176   : > { %v672_v51 = vadd.f32 %v667_v50, %v319_v47 }
 0x178   : > { %673 = vst [vmem:[#allocation2] sm:$0xff] %v672_v51 }
 0x17f   : > { %v678_v56 = vld [vmem:[#allocation2] sm:$0xff] }
 0x180   : > { %v679_v57 = vmax.f32 %v678_v56, 0.0 }
 0x182   : > { %680 = vst [vmem:[#allocation2] sm:$0xff] %v679_v57  ;;  %v682_v63 = vpack.c.bf16 %v679_v57, %v679_v57 }
 0x184   : > { %1038 = vmatmul.mubr.bf16.vlgmr.msra.gmra.mrb[0].mxu0 %v682_v63 }
 0x257   : > { %v788_v1 = vpop.f32.mrb[0].mxu0 }
 0x258   : > { %v789_v2 = vadd.f32 %v953_v0, %v788_v1  ;;  %v1039_v3 = vpop.f32.mrb[1].mxu0 }
 0x259   : > { %v791_v4 = vpop.f32.mrb[2].mxu0 }
 0x25a   : > { %794 = vst [vmem:[#allocation9] sm:$0xff] %v789_v2  ;;  %v1040_v5 = vpop.f32.mrb[3].mxu0 }
 0x25b PF: > { %p1067_p11 = scmp.eq.s32.totalorder %s1412_s24, 1  ;;  %s1352_s18 = smov [#allocation9]  }
 0x25c   : > { %s804_s7 = sshll.u32 %s1352_s18, 4  ;;  %s805_s7 = int_to_ptr.vmem [resolvable:$true] %s804_s7 }
 0x25d   : > { %s1255_s27 = scalar_lea.vmem %s805_s7, 128  ;;  %p1262_p0 = scmp.lt.s32.totalorder %s805_s7, %s805_s7 }
 0x25e   : > { %p1256_p13 = scmp.ne.s32.totalorder %s805_s7, %s1255_s27  ;;  %p1263_p6 = scmp.lt.s32.totalorder %s1255_s27, %s1255_s27 }
 0x260   : > { %p1257_p2 = pnand %p1256_p13, %p1067_p11  ;;  %p1264_p4 = por %p1263_p6, %p1262_p0 }
 0x262   : > { %p1258_p3 = pneg %p1257_p2 }
 0x264   : > { %p1265_p5 = pnand %p1264_p4, %p1258_p3 }
 0x266   : > { %1268 = shalt.err (!%p1265_p5)
}
 0x267   : > { %s1269_s29 = scalar_lea.hbm %s1659_s5, 128 }
 0x268   : > { %p1270_p12 = scmp.ne.s32.totalorder %s1659_s5, %s1269_s29  ;;  %p1275_p8 = scmp.lt.u32.totalorder %s1269_s29, %s1659_s5 }
 0x26a   : > { %p1271_p1 = pnand %p1270_p12, %p1067_p11 }
 0x26c   : > { %p1272_p7 = pneg %p1271_p1 }
 0x26e   : > { %p1277_p9 = pnand %p1275_p8, %p1272_p7 }
 0x270   : > { %1280 = shalt.err (!%p1277_p9)
}
 0x271   : > { %1050 = dma.vmem_to_hbm [thread:$0]  (%p1067_p11), %s805_s7, 128, %s1659_s5, [#allocation5]  }
 0x272   : > { %1318 = dma.done.wait (%p1067_p11), [#allocation5], 128  }
 0x273   : > { %1320 = vsyncadd (%p1067_p11), [#allocation5], 4294967168 }
 0x274 PF: > { %s22_s23 = sadd.s32 1, %s1343_s23   ;;  %s1675_s18 = smov %s1327_s19 }
 0x275   : > { %p19_p10 = scmp.ge.s32.totalorder %s22_s23, 4   ;;  %s1676_s19 = smov %s1331_s20 }
 0x276   : > { %s1677_s20 = smov %s1471_s8  ;;  %s1678_s21 = smov %s1339_s22 }
 0x277   : > { %s1679_s22 = smov %s1681_s30  ;;  %21 = sbr.rel (!%p19_p10) target bundleno = 7 (0x7), region = 103 }
 0x27e   :  { %817 = vsyncpa [#allocation4], 1 }
 0x27f   :  { %819 = vsyncpa [#allocation4 + $0x1], 1 }
 0x280   :  { %820 = vsyncpa [#allocation7], 1 }
 0x281   :  { %822 = vsyncpa [#allocation7 + $0x1], 1 }
 0x282   :  { %823 = vsyncpa [#allocation5], 1 }
 0x283   :  { %825 = vsyncpa [#allocation5 + $0x1], 1 }

// kernel: tpu_custom_call.1
= control target key start
LH: loop header
LB: loop body
LE: loop exit
PB: predicated region body
PF: predicated region fallthrough
CT: control target
= control target key end

     0   :  { %10 = vsyncpa [#allocation4], 0  ;;  %s1654_s0 = inlined_call_operand.hbm [shape: bf16[8,1024], index: 0, kind: input, shape index: {}]   ;;  %s1655_s1 = inlined_call_operand.hbm [shape: bf16[1024,128], index: 1, kind: input, shape index: {}]   ;;  %s1656_s2 = inlined_call_operand.vmem [shape: f32[1,128], index: 2, kind: input, shape index: {}]   ;;  %s1657_s3 = inlined_call_operand.hbm [shape: bf16[128,128], index: 3, kind: input, shape index: {}]   ;;  %s1658_s4 = inlined_call_operand.vmem [shape: f32[1,128], index: 4, kind: input, shape index: {}]   ;;  %s1659_s5 = inlined_call_operand.hbm [shape: f32[8,128], index: 5, kind: output, shape index: {}]  }
   0x1   :  { %12 = vsyncpa [#allocation4 + $0x1], 0 }
   0x2   :  { %13 = vsyncpa [#allocation7], 0 }
   0x3   :  { %15 = vsyncpa [#allocation7 + $0x1], 0 }
   0x4   :  { %16 = vsyncpa [#allocation5], 0  ;;  %s1383_s18 = smov 0   ;;  %s1385_s19 = smov 0  }
   0x5   :  { %s1387_s20 = smov 0   ;;  %s1389_s21 = smov 0  }
   0x6   :  { %s1391_s22 = smov 0   ;;  %s1393_s23 = smov 0  }
   0x7 LB: > { %s1412_s24 = sadd.s32 4294967295, %s1343_s23   ;;  %p56_p0 = scmp.ne.s32.totalorder %s1327_s19, %s1323_s18  ;;  %s1343_s23 = sphi %s1393_s23, %s22_s23   ;;  %s1339_s22 = sphi %s1391_s22, %s1679_s22   ;;  %s1335_s21 = sphi %s1389_s21, %s1678_s21   ;;  %s1331_s20 = sphi %s1387_s20, %s1677_s20   ;;  %s1327_s19 = sphi %s1385_s19, %s1676_s19   ;;  %s1323_s18 = sphi %s1383_s18, %s1675_s18  }
   0x8   : > { %p1660_p1 = scmp.eq.s32.totalorder %s1412_s24, 0  ;;  %p901_p2 = scmp.ge.s32.totalorder %s1343_s23, 1 }
   0x9   : > { %p182_p3 = scmp.lt.s32.totalorder %s1343_s23, 3  ;;  %s1345_s27 = smov [#allocation8]  }
   0xa   : > { %p1420_p4 = por %p1660_p1, %p56_p0  ;;  %s197_s28 = sshll.u32 %s1345_s27, 4  ;;  %s198_s28 = int_to_ptr.vmem [resolvable:$true] %s197_s28 }
   0xb   : > { %p1424_p5 = pnand %p901_p2, %p182_p3  ;;  %s31_s30 = sadd.s32 1, %s1339_s22 }
   0xc   : > { %s1665_s25 = scalar_select %p1420_p4, 1, 0 }
   0xd   : > { %s1666_s26 = scalar_select %p1424_p5, 1, 0 }
   0xe   : > { %p1053_p6 = pneg %p1424_p5  ;;  %s1167_s8 = scalar_lea.hbm %s1657_s3, 1024 }
   0xf   : > { %p1168_p8 = scmp.ne.s32.totalorder %s1657_s3, %s1167_s8  ;;  %p1174_p12 = scmp.lt.u32.totalorder %s1167_s8, %s1657_s3 }
  0x10   : > { %p1432_p7 = pnand %p1053_p6, %p1660_p1 }
  0x12   : > { %p1169_p9 = pneg %p1432_p7 }
  0x14   : > { %p1170_p10 = pnand %p1169_p9, %p1168_p8 }
  0x16   : > { %p1171_p11 = pneg %p1170_p10 }
  0x18   : > { %p1176_p13 = pnand %p1174_p12, %p1171_p11 }
  0x1a   : > { %1179 = shalt.err (!%p1176_p13)
}
  0x1b   : > { %s1180_s13 = scalar_lea.vmem %s198_s28, 1024  ;;  %p1188_p6 = scmp.lt.s32.totalorder %s198_s28, %s198_s28 }
  0x1c   : > { %p1181_p0 = scmp.ne.s32.totalorder %s198_s28, %s1180_s13  ;;  %p1189_p1 = scmp.lt.s32.totalorder %s1180_s13, %s1180_s13 }
  0x1e   : > { %p1183_p2 = pnand %p1181_p0, %p1169_p9  ;;  %p1190_p4 = por %p1189_p1, %p1188_p6 }
  0x20   : > { %p1184_p3 = pneg %p1183_p2 }
  0x22   : > { %p1191_p5 = pnand %p1190_p4, %p1184_p3 }
  0x24   : > { %1194 = shalt.err (!%p1191_p5)
}
  0x25   : > { %s1663_s14 = smov 64   ;;  %s1664_s15 = smov 4  }
  0x26   : > { %1056 = dma.hbm_to_vmem [thread:$0]  (!%p1432_p7), %s1657_s3, 1024, %s198_s28, [#allocation7], %s1663_s14, %s1663_s14, %s1664_s15  }
  0x27   : > { %p32_p1 = scmp.ge.s32.totalorder %s31_s30, 2  ;;  %s43_s18 = sadd.s32 1, %s1331_s20 }
  0x28   : > { %p50_p4 = scmp.ne.s32.totalorder %s1331_s20, %s1327_s19  ;;  %p51_p5 = scmp.eq.s32.totalorder %s1343_s23, 0 }
  0x29   : > { %s1681_s30 = smov (%p32_p1, %s31_s30), 0  ;;  %p1065_p9 = scmp.lt.s32.totalorder %s1343_s23, 2 }
  0x2a   : > { %p52_p8 = por %p51_p5, %p50_p4  ;;  %s39_s27 = ssub.s32 %s1339_s22, %s1681_s30 }
  0x2b   : > { %s1466_s6 = sand.u32 1, %s1331_s20   ;;  %p41_p10 = scmp.eq.s32.totalorder %s39_s27, 0 }
  0x2c   : > { %s904_s29 = sshll.u32 %s1466_s6, 4  ;;  %s966_s7 = sshll.u32 %s1339_s22, 8 }
  0x2d   : > { %s1471_s8 = scalar_select %p41_p10, %s1331_s20, %s43_s18  }
  0x2e   : > { %s1476_s10 = scalar_lea.hbm %s1654_s0, %s966_s7  ;;  %s218_s11 = scalar_lea.vmem [#allocation3], %s904_s29 }
  0x2f   : > { %s228_s12 = sshll.u32 %s218_s11, 4  ;;  %p1478_p7 = pnand %p1065_p9, %p52_p8  ;;  %s1482_s12 = int_to_ptr.vmem [resolvable:$true] %s228_s12 }
  0x30   : > { %s907_s16 = sshll.u32 %s1466_s6, 8  ;;  %s215_s17 = scalar_lea.sflag [#allocation4], %s1466_s6 }
  0x31   : > { %s1195_s18 = scalar_lea.hbm %s1476_s10, 256  ;;  %p1197_p12 = pneg %p1478_p7 }
  0x32   : > { %p1196_p11 = scmp.ne.s32.totalorder %s1476_s10, %s1195_s18  ;;  %s1200_s7 = scalar_lea.hbm %s1654_s0, 512 }
  0x33   : > { %p1201_p2 = scmp.lt.u32.totalorder %s1476_s10, %s1654_s0  ;;  %p1202_p3 = scmp.lt.u32.totalorder %s1200_s7, %s1195_s18 }
  0x34   : > { %p1198_p13 = pnand %p1197_p12, %p1196_p11  ;;  %p1204_p1 = scmp.lt.u32.totalorder %s1195_s18, %s1476_s10 }
  0x35   : > { %p1203_p6 = por %p1202_p3, %p1201_p2 }
  0x36   : > { %p1199_p0 = pneg %p1198_p13 }
  0x37   : > { %p1205_p4 = por %p1204_p1, %p1203_p6 }
  0x39   : > { %p1206_p5 = pnand %p1205_p4, %p1199_p0 }
  0x3b   : > { %1209 = shalt.err (!%p1206_p5)
}
  0x3c   : > { %s1210_s11 = scalar_lea.vmem %s1482_s12, 256  ;;  %s1348_s27 = smov [#allocation3]  }
  0x3d   : > { %p1211_p8 = scmp.ne.s32.totalorder %s1482_s12, %s1210_s11  ;;  %s1215_s29 = sshll.u32 %s1348_s27, 4  ;;  %s1216_s29 = int_to_ptr.vmem [resolvable:$false] %s1215_s29 }
  0x3e   : > { %s1217_s28 = scalar_lea.vmem %s1216_s29, 512  ;;  %p1218_p11 = scmp.lt.s32.totalorder %s1482_s12, %s1216_s29 }
  0x3f   : > { %p1213_p9 = pnand %p1211_p8, %p1197_p12  ;;  %p1219_p13 = scmp.lt.s32.totalorder %s1217_s28, %s1210_s11 }
  0x41   : > { %p1214_p10 = pneg %p1213_p9  ;;  %p1220_p2 = por %p1219_p13, %p1218_p11 }
  0x43   : > { %p1221_p3 = pnand %p1220_p2, %p1214_p10 }
  0x45   : > { %1224 = shalt.err (!%p1221_p3)
}
  0x46   : > { %1060 = dma.hbm_to_vmem [thread:$0]  (!%p1478_p7), %s1476_s10, 256, %s1482_s12, %s215_s17  }
  0x47   : > { %s967_s18 = sshll.u32 %s1339_s22, 12  ;;  %s239_s7 = scalar_lea.vmem [#allocation6], %s907_s16 }
  0x48   : > { %s246_s9 = sshll.u32 %s239_s7, 4  ;;  %s235_s27 = sand.u32 1, %s1343_s23   ;;  %s1514_s9 = int_to_ptr.vmem [resolvable:$true] %s246_s9 }
  0x49   : > { %s1520_s28 = scalar_lea.hbm %s1655_s1, %s967_s18  ;;  %s1522_s14 = scalar_lea.sflag [#allocation7], %s235_s27 }
  0x4a   : > { %s1225_s15 = scalar_lea.hbm %s1520_s28, 4096  ;;  %s1230_s12 = scalar_lea.hbm %s1655_s1, 8192 }
  0x4b   : > { %p1226_p0 = scmp.ne.s32.totalorder %s1520_s28, %s1225_s15  ;;  %p1231_p4 = scmp.lt.u32.totalorder %s1520_s28, %s1655_s1 }
  0x4c   : > { %p1232_p5 = scmp.lt.u32.totalorder %s1230_s12, %s1225_s15  ;;  %p1234_p9 = scmp.lt.u32.totalorder %s1225_s15, %s1520_s28 }
  0x4d   : > { %p1228_p6 = pnand %p1226_p0, %p1197_p12 }
  0x4e   : > { %p1233_p8 = por %p1232_p5, %p1231_p4 }
  0x4f   : > { %p1229_p1 = pneg %p1228_p6 }
  0x50   : > { %p1235_p10 = por %p1234_p9, %p1233_p8 }
  0x52   : > { %p1236_p11 = pnand %p1235_p10, %p1229_p1 }
  0x54   : > { %1239 = shalt.err (!%p1236_p11)
}
  0x55   : > { %s1240_s18 = scalar_lea.vmem %s1514_s9, 4096  ;;  %s1349_s7 = smov [#allocation6]  }
  0x56   : > { %p1241_p13 = scmp.ne.s32.totalorder %s1514_s9, %s1240_s18  ;;  %s1245_s27 = sshll.u32 %s1349_s7, 4  ;;  %s1246_s27 = int_to_ptr.vmem [resolvable:$false] %s1245_s27 }
  0x57   : > { %s1247_s11 = scalar_lea.vmem %s1246_s27, 8192  ;;  %p1248_p0 = scmp.lt.s32.totalorder %s1514_s9, %s1246_s27 }
  0x58   : > { %p1243_p2 = pnand %p1241_p13, %p1197_p12  ;;  %p1249_p6 = scmp.lt.s32.totalorder %s1247_s11, %s1240_s18 }
  0x5a   : > { %p1244_p3 = pneg %p1243_p2  ;;  %p1250_p4 = por %p1249_p6, %p1248_p0 }
  0x5c   : > { %p1251_p5 = pnand %p1250_p4, %p1244_p3 }
  0x5e   : > { %1254 = shalt.err (!%p1251_p5)
}
  0x5f   : > { %s1669_s15 = smov 4   ;;  %s1670_s29 = smov 64  }
  0x60   : > { %1063 = dma.hbm_to_vmem [thread:$0]  (!%p1478_p7), %s1520_s28, 4096, %s1514_s9, %s1522_s14, %s1670_s29, %s1670_s29, %s1669_s15  }
  0x61   : > { %p1671_p12 = scmp.ne.s32.totalorder %s1666_s26, 0 }
  0x62   : > { %s260_s6 = sand.u32 (!%p1671_p12), 1, %s1327_s19   ;;  %p1672_p1 = scmp.ne.s32.totalorder (!%p1671_p12), %s1665_s25, 0 }
  0x63   : > { %258 = sbr.rel (%p1671_p12) target bundleno = 628 (0x274), region = 40  ;;  %s911_s10 = sshll.u32 (!%p1671_p12), %s260_s6, 4 }
  0x64   : > { %s261_s12 = scalar_lea.sflag (!%p1671_p12), [#allocation4], %s260_s6  ;;  %s1554_s16 = scalar_lea.vmem (!%p1671_p12), [#allocation3], %s911_s10 }
  0x6a   : > { %1306 = dma.done.wait (%p1672_p1), %s261_s12, 256  }
  0x6b   : > { %1308 = vsyncadd (%p1672_p1), %s261_s12, 4294967040  ;;  %s269_s13 = sand.u32 1, %s1412_s24   ;;  %s912_s17 = sshll.u32 %s260_s6, 8 }
  0x6c   : > { %s270_s14 = scalar_lea.sflag [#allocation7], %s269_s13  ;;  %s1561_s9 = scalar_lea.vmem [#allocation6], %s912_s17 }
  0x6d   : > { %1310 = dma.done.wait (%p1672_p1), %s270_s14, 4096  }
  0x6e   : > { %1312 = vsyncadd (%p1672_p1), %s270_s14, 4294963200  ;;  %p1673_p7 = scmp.eq.s32.totalorder %s1412_s24, 0 }
  0x70   : > { %1314 = dma.done.wait (%p1673_p7), [#allocation7], 1024   ;;  %p1674_p8 = pmov %p1673_p7 }
  0x71   : > { %p914_p9 = scmp.ne.s32.totalorder %s1335_s21, 0 }
  0x72   : > { %1316 = vsyncadd (%p1674_p8), [#allocation7], 4294966272  ;;  %v915_v0 = vld [vmem:[%s1656_s2] ss:$0 sm:$0xff] (!%p914_p9) }
  0x73   : > { %310 = sbr.rel (%p914_p9) target bundleno = 122 (0x7a), region = 56  ;;  %318 = vst [vmem:[#allocation2] sm:$0xff] (!%p914_p9), %v915_v0 }
  0x7a PF: > { %v1123_v1 = vld [vmem:[%s1561_s9 + $0x40] sm:$0xff]   ;;  %v1127_v5 = vld [vmem:[%s1561_s9 + $0x48] sm:$0xff]   ;;  %v1131_v9 = vld [vmem:[%s1561_s9 + $0x50] sm:$0xff]   ;;  %p952_p10 = scmp.ne.s32.totalorder %s1335_s21, 1 }
  0x7b   : > { %v1124_v2 = vld [vmem:[%s1561_s9 + $0xc0] sm:$0xff]   ;;  %968 = vmatprep.subr.bf16.mxu0 %v1123_v1  ;;  %v1128_v6 = vld [vmem:[%s1561_s9 + $0xc8] sm:$0xff]   ;;  %v1132_v10 = vld [vmem:[%s1561_s9 + $0xd0] sm:$0xff]   ;;  %v1350_v53 = vmov (!%p952_p10), 0.0   ;;  %vm1351_vm0 = vmmov (!%p952_p10), 0  }
  0x7c   : > { %v1125_v3 = vld [vmem:[%s1561_s9] sm:$0xff]   ;;  %990 = vmatprep.subr.bf16.mxu1 %v1124_v2  ;;  %v1129_v7 = vld [vmem:[%s1561_s9 + $0x8] sm:$0xff]   ;;  %v1133_v11 = vld [vmem:[%s1561_s9 + $0x10] sm:$0xff]  }
  0x7d   : > { %v1126_v4 = vld [vmem:[%s1561_s9 + $0x80] sm:$0xff]   ;;  %969 = vmatpush3.bf16.msra.mxu0 %v1125_v3  ;;  %v1130_v8 = vld [vmem:[%s1561_s9 + $0x88] sm:$0xff]   ;;  %v1134_v12 = vld [vmem:[%s1561_s9 + $0x90] sm:$0xff]  }
  0x7e   : > { %991 = vmatpush3.bf16.msra.mxu1 %v1126_v4  ;;  %970 = vmatprep.subr.bf16.mxu0 %v1127_v5  ;;  %v1135_v13 = vld [vmem:[%s1561_s9 + $0x58] sm:$0xff]   ;;  %v1139_v17 = vld [vmem:[%s1561_s9 + $0x60] sm:$0xff]   ;;  %v1143_v21 = vld [vmem:[%s1561_s9 + $0x68] sm:$0xff]  }
  0x7f   : > { %992 = vmatprep.subr.bf16.mxu1 %v1128_v6  ;;  %v1136_v14 = vld [vmem:[%s1561_s9 + $0xd8] sm:$0xff]   ;;  %v1140_v18 = vld [vmem:[%s1561_s9 + $0xe0] sm:$0xff]   ;;  %v1144_v22 = vld [vmem:[%s1561_s9 + $0xe8] sm:$0xff]  }
  0x80   : > { %v1137_v15 = vld [vmem:[%s1561_s9 + $0x18] sm:$0xff]   ;;  %v1141_v19 = vld [vmem:[%s1561_s9 + $0x20] sm:$0xff]   ;;  %v1145_v23 = vld [vmem:[%s1561_s9 + $0x28] sm:$0xff]  }
  0x81   : > { %971 = vmatpush3.bf16.msra.mxu0 %v1129_v7  ;;  %v1138_v16 = vld [vmem:[%s1561_s9 + $0x98] sm:$0xff]   ;;  %v1142_v20 = vld [vmem:[%s1561_s9 + $0xa0] sm:$0xff]   ;;  %v1146_v24 = vld [vmem:[%s1561_s9 + $0xa8] sm:$0xff]  }
  0x82   : > { %993 = vmatpush3.bf16.msra.mxu1 %v1130_v8  ;;  %972 = vmatprep.subr.bf16.mxu0 %v1131_v9  ;;  %v1147_v25 = vld [vmem:[%s1561_s9 + $0x70] sm:$0xff]   ;;  %v1151_v29 = vld [vmem:[%s1561_s9 + $0x78] sm:$0xff]   ;;  %v1159_v52 = vld [vmem:[#allocation8] sm:$0xff] (!%p952_p10)  }
  0x83   : > { %994 = vmatprep.subr.bf16.mxu1 %v1132_v10  ;;  %v1148_v26 = vld [vmem:[%s1561_s9 + $0xf0] sm:$0xff]   ;;  %v1152_v30 = vld [vmem:[%s1561_s9 + $0xf8] sm:$0xff]   ;;  %v1160_v54 = vld [vmem:[#allocation8 + $0x8] sm:$0xff] (!%p952_p10)  }
  0x84   : > { %v1149_v27 = vld [vmem:[%s1561_s9 + $0x30] sm:$0xff]   ;;  %v1153_v31 = vld [vmem:[%s1561_s9 + $0x38] sm:$0xff]   ;;  %v1163_v59 = vld [vmem:[#allocation8 + $0x20] sm:$0xff] (!%p952_p10)  }
  0x85   : > { %973 = vmatpush3.bf16.msra.mxu0 %v1133_v11  ;;  %v1150_v28 = vld [vmem:[%s1561_s9 + $0xb0] sm:$0xff]   ;;  %v1154_v32 = vld [vmem:[%s1561_s9 + $0xb8] sm:$0xff]   ;;  %v1164_v60 = vld [vmem:[#allocation8 + $0x28] sm:$0xff] (!%p952_p10)  }
  0x86   : > { %995 = vmatpush3.bf16.msra.mxu1 %v1134_v12  ;;  %974 = vmatprep.subr.bf16.mxu0 %v1135_v13  ;;  %v320_v33 = vld [vmem:[%s1554_s16] sm:$0xff]  ;;  %v321_v34 = vld [vmem:[%s1554_s16 + $0x8] sm:$0xff] }
  0x87   : > { %996 = vmatprep.subr.bf16.mxu1 %v1136_v14  ;;  %v916_v35 = vcombine.low %v320_v33, %v320_v33  ;;  %v917_v36 = vcombine.high %v320_v33, %v320_v33  ;;  %v918_v37 = vcombine.low %v321_v34, %v321_v34  ;;  %v919_v38 = vcombine.high %v321_v34, %v321_v34  ;;  %v319_v47 = vld [vmem:[#allocation2] sm:$0xff]  ;;  %v1161_v55 = vld [vmem:[#allocation8 + $0x10] sm:$0xff] (!%p952_p10)  }
  0x88   : > { %v1162_v58 = vld [vmem:[#allocation8 + $0x18] sm:$0xff] (!%p952_p10)   ;;  %v1165_v61 = vld [vmem:[#allocation8 + $0x30] sm:$0xff] (!%p952_p10)  }
  0x89   : > { %975 = vmatpush3.bf16.msra.mxu0 %v1137_v15  ;;  %624 = vmatprep.mubr.bf16.mxu0 %v917_v36  ;;  %v1166_v62 = vld [vmem:[#allocation8 + $0x38] sm:$0xff] (!%p952_p10)  }
  0x8a   : > { %997 = vmatpush3.bf16.msra.mxu1 %v1138_v16  ;;  %976 = vmatprep.subr.bf16.mxu0 %v1139_v17  ;;  %v953_v0 = vld [vmem:[%s1658_s4] ss:$0 sm:$0xff] (!%p952_p10) }
  0x8b   : > { %998 = vmatprep.subr.bf16.mxu1 %v1140_v18  ;;  %664 = vmatprep.mubr.bf16.mxu1 %v919_v38 }
  0x8d   : > { %977 = vmatpush3.bf16.msra.mxu0 %v1141_v19 }
  0x8e   : > { %999 = vmatpush3.bf16.msra.mxu1 %v1142_v20  ;;  %978 = vmatprep.subr.bf16.mxu0 %v1143_v21 }
  0x8f   : > { %1000 = vmatprep.subr.bf16.mxu1 %v1144_v22 }
  0x91   : > { %979 = vmatpush3.bf16.msra.mxu0 %v1145_v23 }
  0x92   : > { %1001 = vmatpush3.bf16.msra.mxu1 %v1146_v24  ;;  %980 = vmatprep.subr.bf16.mxu0 %v1147_v25 }
  0x93   : > { %1002 = vmatprep.subr.bf16.mxu1 %v1148_v26 }
  0x95   : > { %981 = vmatpush3.bf16.msra.mxu0 %v1149_v27 }
  0x96   : > { %1003 = vmatpush3.bf16.msra.mxu1 %v1150_v28  ;;  %982 = vmatprep.subr.bf16.mxu0 %v1151_v29 }
  0x97   : > { %1004 = vmatprep.subr.bf16.mxu1 %v1152_v30 }
  0x99   : > { %983 = vmatpush3.bf16.msra.mxu0 %v1153_v31 }
  0x9a   : > { %1005 = vmatpush3.bf16.msra.mxu1 %v1154_v32  ;;  %1021 = vmatprep.subr.bf16.mxu0 (!%p952_p10), %v1350_v53 }
  0x9c   : > { %625 = vmatmul.mubr.bf16.vlgmr.msra.gmra.mrb[0].mxu0 %v916_v35 }
  0x9d   : > { %665 = vmatmul.mubr.bf16.vlgmr.msra.gmra.mrb[0].mxu1 %v918_v37  ;;  %1022 = vmatpush3.bf16.msra.mxu0 (!%p952_p10), %v1159_v52 }
  0x9e   : > { %1037 = vmatprep.mubr.msk.bf16.mxu0 (!%p952_p10), %vm1351_vm0, %v1350_v53  ;;  %1023 = vmatprep.subr.bf16.mxu0 (!%p952_p10), %v1350_v53 }
  0xa1   : > { %1024 = vmatpush3.bf16.msra.mxu0 (!%p952_p10), %v1160_v54 }
  0xa2   : > { %1025 = vmatprep.subr.bf16.mxu0 (!%p952_p10), %v1350_v53 }
  0xa5   : > { %1026 = vmatpush3.bf16.msra.mxu0 (!%p952_p10), %v1161_v55 }
  0xa6   : > { %1027 = vmatprep.subr.bf16.mxu0 (!%p952_p10), %v1350_v53 }
  0xa9   : > { %1028 = vmatpush3.bf16.msra.mxu0 (!%p952_p10), %v1162_v58 }
  0xaa   : > { %1029 = vmatprep.subr.bf16.mxu0 (!%p952_p10), %v1350_v53 }
  0xad   : > { %1030 = vmatpush3.bf16.msra.mxu0 (!%p952_p10), %v1163_v59 }
  0xae   : > { %1031 = vmatprep.subr.bf16.mxu0 (!%p952_p10), %v1350_v53 }
  0xb1   : > { %1032 = vmatpush3.bf16.msra.mxu0 (!%p952_p10), %v1164_v60 }
  0xb2   : > { %1033 = vmatprep.subr.bf16.mxu0 (!%p952_p10), %v1350_v53 }
  0xb5   : > { %1034 = vmatpush3.bf16.msra.mxu0 (!%p952_p10), %v1165_v61 }
  0xb6   : > { %1035 = vmatprep.subr.bf16.mxu0 (!%p952_p10), %v1350_v53 }
  0xb9   : > { %1036 = vmatpush3.bf16.msra.mxu0 (!%p952_p10), %v1166_v62 }
 0x16f   : > { %v984_v39 = vpop.f32.mrb[0].mxu0 }
 0x170   : > { %v1006_v40 = vpop.f32.mrb[0].mxu1  ;;  %v985_v41 = vpop.f32.mrb[1].mxu0 }
 0x171   : > { %v1007_v42 = vpop.f32.mrb[1].mxu1  ;;  %v986_v43 = vadd.f32 %v985_v41, %v984_v39  ;;  %v987_v45 = vpop.f32.mrb[2].mxu0 }
 0x172   : > { %v1008_v44 = vadd.f32 %v1007_v42, %v1006_v40  ;;  %v1009_v46 = vpop.f32.mrb[2].mxu1  ;;  %v988_v48 = vpop.f32.mrb[3].mxu0  ;;  %677 = sbr.rel (%p952_p10) target bundleno = 603 (0x25b), region = 60 }
 0x173   : > { %v1010_v49 = vpop.f32.mrb[3].mxu1 }
 0x174   : > { %v667_v50 = vadd.f32 %v1008_v44, %v986_v43 }
 0x176   : > { %v672_v51 = vadd.f32 %v667_v50, %v319_v47 }
 0x178   : > { %673 = vst [vmem:[#allocation2] sm:$0xff] %v672_v51 }
 0x17f   : > { %v678_v56 = vld [vmem:[#allocation2] sm:$0xff] }
 0x180   : > { %v679_v57 = vmax.f32 %v678_v56, 0.0 }
 0x182   : > { %680 = vst [vmem:[#allocation2] sm:$0xff] %v679_v57  ;;  %v682_v63 = vpack.c.bf16 %v679_v57, %v679_v57 }
 0x184   : > { %1038 = vmatmul.mubr.bf16.vlgmr.msra.gmra.mrb[0].mxu0 %v682_v63 }
 0x257   : > { %v788_v1 = vpop.f32.mrb[0].mxu0 }
 0x258   : > { %v789_v2 = vadd.f32 %v953_v0, %v788_v1  ;;  %v1039_v3 = vpop.f32.mrb[1].mxu0 }
 0x259   : > { %v791_v4 = vpop.f32.mrb[2].mxu0 }
 0x25a   : > { %794 = vst [vmem:[#allocation9] sm:$0xff] %v789_v2  ;;  %v1040_v5 = vpop.f32.mrb[3].mxu0 }
 0x25b PF: > { %p1067_p11 = scmp.eq.s32.totalorder %s1412_s24, 1  ;;  %s1352_s18 = smov [#allocation9]  }
 0x25c   : > { %s804_s7 = sshll.u32 %s1352_s18, 4  ;;  %s805_s7 = int_to_ptr.vmem [resolvable:$true] %s804_s7 }
 0x25d   : > { %s1255_s27 = scalar_lea.vmem %s805_s7, 128  ;;  %p1262_p0 = scmp.lt.s32.totalorder %s805_s7, %s805_s7 }
 0x25e   : > { %p1256_p13 = scmp.ne.s32.totalorder %s805_s7, %s1255_s27  ;;  %p1263_p6 = scmp.lt.s32.totalorder %s1255_s27, %s1255_s27 }
 0x260   : > { %p1257_p2 = pnand %p1256_p13, %p1067_p11  ;;  %p1264_p4 = por %p1263_p6, %p1262_p0 }
 0x262   : > { %p1258_p3 = pneg %p1257_p2 }
 0x264   : > { %p1265_p5 = pnand %p1264_p4, %p1258_p3 }
 0x266   : > { %1268 = shalt.err (!%p1265_p5)
}
 0x267   : > { %s1269_s29 = scalar_lea.hbm %s1659_s5, 128 }
 0x268   : > { %p1270_p12 = scmp.ne.s32.totalorder %s1659_s5, %s1269_s29  ;;  %p1275_p8 = scmp.lt.u32.totalorder %s1269_s29, %s1659_s5 }
 0x26a   : > { %p1271_p1 = pnand %p1270_p12, %p1067_p11 }
 0x26c   : > { %p1272_p7 = pneg %p1271_p1 }
 0x26e   : > { %p1277_p9 = pnand %p1275_p8, %p1272_p7 }
 0x270   : > { %1280 = shalt.err (!%p1277_p9)
}
 0x271   : > { %1050 = dma.vmem_to_hbm [thread:$0]  (%p1067_p11), %s805_s7, 128, %s1659_s5, [#allocation5]  }
 0x272   : > { %1318 = dma.done.wait (%p1067_p11), [#allocation5], 128  }
 0x273   : > { %1320 = vsyncadd (%p1067_p11), [#allocation5], 4294967168 }
 0x274 PF: > { %s22_s23 = sadd.s32 1, %s1343_s23   ;;  %s1675_s18 = smov %s1327_s19 }
 0x275   : > { %p19_p10 = scmp.ge.s32.totalorder %s22_s23, 4   ;;  %s1676_s19 = smov %s1331_s20 }
 0x276   : > { %s1677_s20 = smov %s1471_s8  ;;  %s1678_s21 = smov %s1339_s22 }
 0x277   : > { %s1679_s22 = smov %s1681_s30  ;;  %21 = sbr.rel (!%p19_p10) target bundleno = 7 (0x7), region = 103 }
 0x27e   :  { %817 = vsyncpa [#allocation4], 1 }
 0x27f   :  { %819 = vsyncpa [#allocation4 + $0x1], 1 }
 0x280   :  { %820 = vsyncpa [#allocation7], 1 }
 0x281   :  { %822 = vsyncpa [#allocation7 + $0x1], 1 }
 0x282   :  { %823 = vsyncpa [#allocation5], 1 }
 0x283   :  { %825 = vsyncpa [#allocation5 + $0x1], 1 }

</bundles_post_ra>
